<compile_context>
chip_gen: v5e
topology: v5e:2x2
jax: 0.10.0
libtpu: 0.0.40
codegen_flags: <defaults>
</compile_context>

<pallas_src>
import functools

import jax
import jax.numpy as jnp
from jax.experimental import pallas as pl
from jax.experimental.pallas import tpu as pltpu


def _round_up(x, m):
    return ((x + m - 1) // m) * m


def _pick_cf_chunk(cfeat):
    """Feature-chunk size: keep the live working set small at real Cfeat."""
    if cfeat <= 256:
        return cfeat
    for c in (256, 128):
        if cfeat % c == 0:
            return c
    return cfeat


# ------------------------------ fused kernel ------------------------------- #

def _hamnet_fused_kernel(x_ref, wc_ref, bc_ref, wf_ref, bf_ref, o_ref, acc_ref,
                         *, cf_chunk, inv_hw, n_pad):
    """Backbone stand-in (1x1 conv + ReLU) + avg-pool + FC + log_softmax.

    Grid = (B, HWp // tile_hw).  Shapes seen by the kernel:
      x_ref  : [1, Cin, tile_hw]   pixels lane-dense, channels on sublanes
      wc_ref : [Cin, Cfeat, 1]     conv weight (whole array, VMEM resident)
      bc_ref : [Cfeat, 1]          conv bias
      wf_ref : [Cfeat, NCP]        FC weight, classes padded to NCP (128)
      bf_ref : [1, NCP]            FC bias (-1e30 in padded class slots)
      o_ref  : [1, 1, NCP]         per-image log-probs (lane-dense)
      acc_ref: [Cfeat, 128]        lane-dense pooled-sum accumulator (scratch)
    """
    t = pl.program_id(1)
    nt = pl.num_programs(1)

    cin = wc_ref.shape[0]
    cfeat = wc_ref.shape[1]
    tile_hw = x_ref.shape[2]
    nk = tile_hw // 128
    n_chunks = cfeat // cf_chunk
    ncp = wf_ref.shape[1]

    @pl.when(t == 0)
    def _init():
        acc_ref[...] = jnp.zeros_like(acc_ref)

    # Stand-in backbone + pool accumulation, chunked over Cfeat so the live
    # intermediates stay well under the vreg file even at Cfeat = 2048.
    def chunk_body(fc, carry):
        start = pl.multiple_of(fc * cf_chunk, cf_chunk)
        w = [wc_ref[c, pl.ds(start, cf_chunk), :] for c in range(cin)]   # [cf,1]
        b = bc_ref[pl.ds(start, cf_chunk), :]                            # [cf,1]
        acc = acc_ref[pl.ds(start, cf_chunk), :]                         # [cf,128]
        for k in range(nk):                                  # static, small
            xb = x_ref[0, :, k * 128:(k + 1) * 128]          # [Cin, 128]
            y = w[0] * xb[0:1, :]                            # init from ch 0
            for c in range(1, cin):
                y = y + w[c] * xb[c:c + 1, :]                # [cf, 128]
            acc = acc + jnp.maximum(y + b, 0.0)              # VPU adds only
        acc_ref[pl.ds(start, cf_chunk), :] = acc
        return carry

    jax.lax.fori_loop(0, n_chunks, chunk_body, 0)

    # Final grid step for this image: finish pool, FC head, log_softmax.
    @pl.when(t == nt - 1)
    def _finalize():
        if n_pad:  # static: exact compensation for zero-padded pixels,
            #        each of which contributed relu(b_conv) to the sum.
            acc_ref[:, 0:1] = acc_ref[:, 0:1] - (
                jnp.float32(n_pad) * jnp.maximum(bc_ref[...], 0.0))
        # Contract Cfeat on the (otherwise idle) MXU with transposed LHS,
        # then one sublane reduce of the 128 partial rows -> lane-dense logits.
        partial = jax.lax.dot_general(
            acc_ref[...], wf_ref[...],
            dimension_numbers=(((0,), (0,)), ((), ())),
            preferred_element_type=jnp.float32)                     # [128, NCP]
        logits = jnp.sum(partial, axis=0, keepdims=True) * inv_hw + bf_ref[...]
        mx = jnp.max(logits, axis=-1, keepdims=True)
        z = logits - mx
        lse = jnp.log(jnp.sum(jnp.exp(z), axis=-1, keepdims=True))
        o_ref[...] = (z - lse).reshape(1, 1, ncp)


# ------------------------------ JAX wrapper -------------------------------- #

def hamnet_forward(x_nchw, params, *, n_classes, block_hw=2048):
    """x_nchw: [B, 3, H, W] float32  ->  log-probabilities [B, n_classes]."""
    B, Cin, H, W = x_nchw.shape
    HW = H * W
    Cfeat = params["w_conv"].shape[1]
    NCP = _round_up(n_classes, 128)

    # NCHW -> [B, Cin, HW]: contiguous reshape, no HBM transpose pass.
    # Zero-pad pixels so HW is a multiple of 128 (keeps the aligned, pipelined
    # path); the pad contribution is removed exactly inside the kernel.
    HWp = _round_up(HW, 128)
    n_pad = HWp - HW
    x3 = x_nchw.reshape(B, Cin, HW)
    if n_pad:
        x3 = jnp.pad(x3, ((0, 0), (0, 0), (0, n_pad)))

    # HW tile: largest multiple of 128 <= block_hw that divides padded HW.
    tile_hw = min(max(128, (block_hw // 128) * 128), HWp)
    while HWp % tile_hw != 0:
        tile_hw -= 128
    num_t = HWp // tile_hw

    cf_chunk = _pick_cf_chunk(Cfeat)

    # Repack the (tiny) weights into kernel-friendly layouts.
    wc_k = params["w_conv"].reshape(Cin, Cfeat, 1).astype(jnp.float32)
    bc_k = params["b_conv"].reshape(Cfeat, 1).astype(jnp.float32)
    # Padded classes: zero weight columns and -1e30 bias, so they vanish from
    # the log-sum-exp without any in-kernel masking.
    wf_k = jnp.zeros((Cfeat, NCP), jnp.float32).at[:, :n_classes].set(
        params["w_fc"].astype(jnp.float32))
    bf_k = jnp.full((1, NCP), -1e30, jnp.float32).at[0, :n_classes].set(
        params["b_fc"].reshape(-1).astype(jnp.float32))

    kernel = functools.partial(_hamnet_fused_kernel,
                               cf_chunk=cf_chunk, inv_hw=1.0 / HW, n_pad=n_pad)

    cost = pl.CostEstimate(
        flops=2 * B * HWp * Cin * Cfeat + 2 * B * 128 * Cfeat * NCP,
        transcendentals=B * (NCP + 1),
        bytes_accessed=4 * (x3.size + wc_k.size + bc_k.size + wf_k.size
                            + bf_k.size + B * NCP),
    )

    out_padded = pl.pallas_call(
        kernel,
        out_shape=jax.ShapeDtypeStruct((B, 1, NCP), jnp.float32),
        grid_spec=pltpu.PrefetchScalarGridSpec(
            num_scalar_prefetch=0,
            grid=(B, num_t),
            in_specs=[
                pl.BlockSpec((1, Cin, tile_hw), lambda b, t: (b, 0, t)),
                # Constant weights/biases: whole-array VMEM residents
                # (single-buffered, loaded once, no per-step DMA).
                pl.BlockSpec(memory_space=pltpu.MemorySpace.VMEM),
                pl.BlockSpec(memory_space=pltpu.MemorySpace.VMEM),
                pl.BlockSpec(memory_space=pltpu.MemorySpace.VMEM),
                pl.BlockSpec(memory_space=pltpu.MemorySpace.VMEM),
            ],
            out_specs=pl.BlockSpec((1, 1, NCP), lambda b, t: (b, 0, 0)),
            scratch_shapes=[pltpu.VMEM((Cfeat, 128), jnp.float32)],
        ),
        compiler_params=pltpu.CompilerParams(
            dimension_semantics=("parallel", "arbitrary"),
            # Actual footprint is only a few MiB even at Cfeat=2048 /
            # tile_hw=2048, so 32 MiB is safe on every generation (v7x incl.).
            vmem_limit_bytes=32 * 1024 * 1024,
        ),
        cost_estimate=cost,
    )(x3, wc_k, bc_k, wf_k, bf_k)

    return out_padded[:, 0, :n_classes]


def hamnet_reference(x_nchw, params):
    B, Cin, H, W = x_nchw.shape
    x = jnp.transpose(x_nchw, (0, 2, 3, 1)).reshape(B, H * W, Cin)
    feat = jnp.maximum(
        jnp.einsum("bnc,cf->bnf", x, params["w_conv"]) + params["b_conv"][None, None, :],
        0.0)
    pooled = feat.mean(axis=1)
    logits = pooled @ params["w_fc"] + params["b_fc"][None, :]
    return jax.nn.log_softmax(logits, axis=1)


# ---------------------------------- main ------------------------------------ #

if __name__ == "__main__":
    B, Cin, H, W = 2, 3, 16, 16   # NCHW image batch, like the PyTorch module
    Cfeat = 128                   # stand-in for final_in_features (2048 in resnet50)
    n_classes = 7                 # HAM10000 has 7 classes

    key = jax.random.PRNGKey(0)
    kx, kwc, kbc, kwf, kbf, kx2 = jax.random.split(key, 6)

    x = jax.random.normal(kx, (B, Cin, H, W), dtype=jnp.float32)
    params = {
        "w_conv": 0.1 * jax.random.normal(kwc, (Cin, Cfeat), dtype=jnp.float32),
        "b_conv": 0.1 * jax.random.normal(kbc, (Cfeat,), dtype=jnp.float32),
        "w_fc": 0.1 * jax.random.normal(kwf, (Cfeat, n_classes), dtype=jnp.float32),
        "b_fc": 0.1 * jax.random.normal(kbf, (n_classes,), dtype=jnp.float32),
    }

    # Test 1: block_hw=128 so the multi-tile pooled accumulation is exercised.
    fwd = jax.jit(functools.partial(hamnet_forward, n_classes=n_classes, block_hw=128))
    out = jax.block_until_ready(fwd(x, params))
    ref = jax.block_until_ready(hamnet_reference(x, params))
    assert out.shape == (B, n_classes), out.shape
    assert jnp.allclose(out, ref, atol=1e-4, rtol=1e-4), \
        "Pallas output mismatch vs JAX reference (aligned HW)"
    assert jnp.allclose(jnp.exp(out).sum(axis=1), 1.0, atol=1e-5)

    # Test 2: HW not a multiple of 128 -> zero-pad + exact pool compensation.
    x2 = jax.random.normal(kx2, (B, Cin, 9, 9), dtype=jnp.float32)
    fwd2 = jax.jit(functools.partial(hamnet_forward, n_classes=n_classes))
    out2 = jax.block_until_ready(fwd2(x2, params))
    ref2 = jax.block_until_ready(hamnet_reference(x2, params))
    assert out2.shape == (B, n_classes), out2.shape
    assert jnp.allclose(out2, ref2, atol=1e-4, rtol=1e-4), \
        "Pallas output mismatch vs JAX reference (padded HW)"
    assert jnp.allclose(jnp.exp(out2).sum(axis=1), 1.0, atol=1e-5)

    print("KERNEL_OK")
</pallas_src>

<mosaic_0001>
module attributes {stable_mosaic.version = 11 : i64} {
  func.func @_hamnet_fused_kernel(%arg0: i32, %arg1: i32, %arg2: memref<1x3x128xf32, #tpu.memory_space<vmem>>, %arg3: memref<3x128x1xf32, #tpu.memory_space<vmem>>, %arg4: memref<128x1xf32, #tpu.memory_space<vmem>>, %arg5: memref<128x128xf32, #tpu.memory_space<vmem>>, %arg6: memref<1x128xf32, #tpu.memory_space<vmem>>, %arg7: memref<1x1x128xf32, #tpu.memory_space<vmem>>, %arg8: memref<128x128xf32, #tpu.memory_space<vmem>>) attributes {dimension_semantics = [#tpu.dimension_semantics<parallel>, #tpu.dimension_semantics<arbitrary>], iteration_bounds = array<i64: 2, 2>, scalar_prefetch = 0 : i64, scratch_operands = 1 : i64, tpu.core_type = #tpu.core_type<tc>, window_params = [{transform_indices = @transform_0, window_bounds = array<i64: 1, 3, 128>}, {pipeline_mode = #tpu.pipeline_mode<synchronous>, transform_indices = @transform_1, window_bounds = array<i64: 3, 128, 1>}, {pipeline_mode = #tpu.pipeline_mode<synchronous>, transform_indices = @transform_2, window_bounds = array<i64: 128, 1>}, {pipeline_mode = #tpu.pipeline_mode<synchronous>, transform_indices = @transform_3, window_bounds = array<i64: 128, 128>}, {pipeline_mode = #tpu.pipeline_mode<synchronous>, transform_indices = @transform_4, window_bounds = array<i64: 1, 128>}, {transform_indices = @transform_5, window_bounds = array<i64: 1, 1, 128>}]} {
    %c0_i32 = arith.constant 0 : i32
    %0 = arith.cmpi eq, %arg1, %c0_i32 : i32
    %1 = arith.extui %0 : i1 to i32
    %c0_i32_0 = arith.constant 0 : i32
    %2 = arith.cmpi ne, %1, %c0_i32_0 : i32
    scf.if %2 {
      %cst_13 = arith.constant 0.000000e+00 : f32
      %44 = vector.broadcast %cst_13 : f32 to vector<128x128xf32>
      %c0_14 = arith.constant 0 : index
      %c0_15 = arith.constant 0 : index
      %45 = vector.load %arg8[%c0_14, %c0_15] : memref<128x128xf32, #tpu.memory_space<vmem>>, vector<128x128xf32>
      tpu.vector_store %arg8[%c0_14, %c0_15], %44 {strides = array<i32>} : memref<128x128xf32, #tpu.memory_space<vmem>>, vector<128x128xf32>,
    } else {
    }
    %c0_i32_1 = arith.constant 0 : i32
    %c128_i32 = arith.constant 128 : i32
    %3 = arith.muli %c0_i32_1, %c128_i32 : i32
    %4 = tpu.assume_multiple %3, 128 : i32
    %c0 = arith.constant 0 : index
    %5 = arith.index_cast %4 : i32 to index
    %c0_2 = arith.constant 0 : index
    %6 = vector.load %arg3[%c0, %5, %c0_2] : memref<3x128x1xf32, #tpu.memory_space<vmem>>, vector<1x128x1xf32>
    %7 = vector.shape_cast %6 : vector<1x128x1xf32> to vector<128x1xf32>
    %c1 = arith.constant 1 : index
    %8 = arith.index_cast %4 : i32 to index
    %c0_3 = arith.constant 0 : index
    %9 = vector.load %arg3[%c1, %8, %c0_3] : memref<3x128x1xf32, #tpu.memory_space<vmem>>, vector<1x128x1xf32>
    %10 = vector.shape_cast %9 : vector<1x128x1xf32> to vector<128x1xf32>
    %c2 = arith.constant 2 : index
    %11 = arith.index_cast %4 : i32 to index
    %c0_4 = arith.constant 0 : index
    %12 = vector.load %arg3[%c2, %11, %c0_4] : memref<3x128x1xf32, #tpu.memory_space<vmem>>, vector<1x128x1xf32>
    %13 = vector.shape_cast %12 : vector<1x128x1xf32> to vector<128x1xf32>
    %14 = arith.index_cast %4 : i32 to index
    %c0_5 = arith.constant 0 : index
    %15 = vector.load %arg4[%14, %c0_5] : memref<128x1xf32, #tpu.memory_space<vmem>>, vector<128x1xf32>
    %16 = arith.index_cast %4 : i32 to index
    %c0_6 = arith.constant 0 : index
    %17 = vector.load %arg8[%16, %c0_6] : memref<128x128xf32, #tpu.memory_space<vmem>>, vector<128x128xf32>
    %c0_7 = arith.constant 0 : index
    %c0_8 = arith.constant 0 : index
    %c0_9 = arith.constant 0 : index
    %18 = vector.load %arg2[%c0_7, %c0_8, %c0_9] : memref<1x3x128xf32, #tpu.memory_space<vmem>>, vector<1x3x128xf32>
    %19 = vector.shape_cast %18 : vector<1x3x128xf32> to vector<3x128xf32>
    %20 = vector.extract_strided_slice %19 {offsets = [0, 0], sizes = [1, 128], strides = [1, 1]} : vector<3x128xf32> to vector<1x128xf32>
    %21 = vector.broadcast %7 : vector<128x1xf32> to vector<128x128xf32>
    %22 = vector.broadcast %20 : vector<1x128xf32> to vector<128x128xf32>
    %23 = arith.mulf %21, %22 : vector<128x128xf32>
    %24 = vector.extract_strided_slice %19 {offsets = [1, 0], sizes = [1, 128], strides = [1, 1]} : vector<3x128xf32> to vector<1x128xf32>
    %25 = vector.broadcast %10 : vector<128x1xf32> to vector<128x128xf32>
    %26 = vector.broadcast %24 : vector<1x128xf32> to vector<128x128xf32>
    %27 = arith.mulf %25, %26 : vector<128x128xf32>
    %28 = arith.addf %23, %27 : vector<128x128xf32>
    %29 = vector.extract_strided_slice %19 {offsets = [2, 0], sizes = [1, 128], strides = [1, 1]} : vector<3x128xf32> to vector<1x128xf32>
    %30 = vector.broadcast %13 : vector<128x1xf32> to vector<128x128xf32>
    %31 = vector.broadcast %29 : vector<1x128xf32> to vector<128x128xf32>
    %32 = arith.mulf %30, %31 : vector<128x128xf32>
    %33 = arith.addf %28, %32 : vector<128x128xf32>
    %34 = vector.broadcast %15 : vector<128x1xf32> to vector<128x128xf32>
    %35 = arith.addf %33, %34 : vector<128x128xf32>
    %cst = arith.constant 0.000000e+00 : f32
    %36 = vector.broadcast %cst : f32 to vector<128x128xf32>
    %37 = arith.maximumf %35, %36 : vector<128x128xf32>
    %38 = arith.addf %17, %37 : vector<128x128xf32>
    %39 = arith.index_cast %4 : i32 to index
    %c0_10 = arith.constant 0 : index
    %40 = vector.load %arg8[%39, %c0_10] : memref<128x128xf32, #tpu.memory_space<vmem>>, vector<128x128xf32>
    tpu.vector_store %arg8[%39, %c0_10], %38 {strides = array<i32>} : memref<128x128xf32, #tpu.memory_space<vmem>>, vector<128x128xf32>,
    %c1_i32 = arith.constant 1 : i32
    %c1_i32_11 = arith.constant 1 : i32
    %41 = arith.cmpi eq, %arg1, %c1_i32_11 : i32
    %42 = arith.extui %41 : i1 to i32
    %c0_i32_12 = arith.constant 0 : i32
    %43 = arith.cmpi ne, %42, %c0_i32_12 : i32
    scf.if %43 {
      %c0_13 = arith.constant 0 : index
      %c0_14 = arith.constant 0 : index
      %44 = vector.load %arg8[%c0_13, %c0_14] : memref<128x128xf32, #tpu.memory_space<vmem>>, vector<128x128xf32>
      %c0_15 = arith.constant 0 : index
      %c0_16 = arith.constant 0 : index
      %45 = vector.load %arg5[%c0_15, %c0_16] : memref<128x128xf32, #tpu.memory_space<vmem>>, vector<128x128xf32>
      %cst_17 = arith.constant dense<0.000000e+00> : vector<128x128xf32>
      %46 = tpu.matmul %44, %45, %cst_17 {dimension_numbers = #tpu.dot_dimension_numbers<[0], [0], [1], [1], [0, 1, 1, 1], [], []>} : vector<128x128xf32>, vector<128x128xf32>, vector<128x128xf32> -> vector<128x128xf32>
      %cst_18 = arith.constant dense<0.000000e+00> : vector<128xf32>
      %47 = vector.multi_reduction <add>, %46, %cst_18 [0] : vector<128x128xf32> to vector<128xf32>
      %48 = vector.shape_cast %47 : vector<128xf32> to vector<1x128xf32>
      %cst_19 = arith.constant 3.906250e-03 : f32
      %49 = vector.broadcast %cst_19 : f32 to vector<1x128xf32>
      %50 = arith.mulf %48, %49 : vector<1x128xf32>
      %c0_20 = arith.constant 0 : index
      %c0_21 = arith.constant 0 : index
      %51 = vector.load %arg6[%c0_20, %c0_21] : memref<1x128xf32, #tpu.memory_space<vmem>>, vector<1x128xf32>
      %52 = arith.addf %50, %51 : vector<1x128xf32>
      %cst_22 = arith.constant dense<0xFF800000> : vector<1xf32>
      %53 = vector.multi_reduction <maximumf>, %52, %cst_22 [1] : vector<1x128xf32> to vector<1xf32>
      %54 = vector.shape_cast %53 : vector<1xf32> to vector<1x1xf32>
      %55 = vector.broadcast %54 : vector<1x1xf32> to vector<1x128xf32>
      %56 = arith.subf %52, %55 : vector<1x128xf32>
      %57 = math.exp %56 : vector<1x128xf32>
      %cst_23 = arith.constant dense<0.000000e+00> : vector<1xf32>
      %58 = vector.multi_reduction <add>, %57, %cst_23 [1] : vector<1x128xf32> to vector<1xf32>
      %59 = vector.shape_cast %58 : vector<1xf32> to vector<1x1xf32>
      %60 = math.log %59 : vector<1x1xf32>
      %61 = vector.broadcast %60 : vector<1x1xf32> to vector<1x128xf32>
      %62 = arith.subf %56, %61 : vector<1x128xf32>
      %63 = vector.shape_cast %62 : vector<1x128xf32> to vector<1x1x128xf32>
      %c0_24 = arith.constant 0 : index
      %c0_25 = arith.constant 0 : index
      %c0_26 = arith.constant 0 : index
      %64 = vector.load %arg7[%c0_24, %c0_25, %c0_26] : memref<1x1x128xf32, #tpu.memory_space<vmem>>, vector<1x1x128xf32>
      tpu.vector_store %arg7[%c0_24, %c0_25, %c0_26], %63 {strides = array<i32>} : memref<1x1x128xf32, #tpu.memory_space<vmem>>, vector<1x1x128xf32>,
    } else {
    }
    return
  }
  func.func @transform_0(%arg0: i32, %arg1: i32) -> (i32, i32, i32) {
    %c0_i32 = arith.constant 0 : i32
    %c0_i32_0 = arith.constant 0 : i32
    return %arg0, %c0_i32, %arg1 : i32, i32, i32
  }
  func.func @transform_1(%arg0: i32, %arg1: i32) -> (i32, i32, i32) {
    %c0_i32 = arith.constant 0 : i32
    %c0_i32_0 = arith.constant 0 : i32
    %c0_i32_1 = arith.constant 0 : i32
    %c0_i32_2 = arith.constant 0 : i32
    return %c0_i32, %c0_i32_0, %c0_i32_1 : i32, i32, i32
  }
  func.func @transform_2(%arg0: i32, %arg1: i32) -> (i32, i32) {
    %c0_i32 = arith.constant 0 : i32
    %c0_i32_0 = arith.constant 0 : i32
    %c0_i32_1 = arith.constant 0 : i32
    return %c0_i32, %c0_i32_0 : i32, i32
  }
  func.func @transform_3(%arg0: i32, %arg1: i32) -> (i32, i32) {
    %c0_i32 = arith.constant 0 : i32
    %c0_i32_0 = arith.constant 0 : i32
    %c0_i32_1 = arith.constant 0 : i32
    return %c0_i32, %c0_i32_0 : i32, i32
  }
  func.func @transform_4(%arg0: i32, %arg1: i32) -> (i32, i32) {
    %c0_i32 = arith.constant 0 : i32
    %c0_i32_0 = arith.constant 0 : i32
    %c0_i32_1 = arith.constant 0 : i32
    return %c0_i32, %c0_i32_0 : i32, i32
  }
  func.func @transform_5(%arg0: i32, %arg1: i32) -> (i32, i32, i32) {
    %c0_i32 = arith.constant 0 : i32
    %c0_i32_0 = arith.constant 0 : i32
    %c0_i32_1 = arith.constant 0 : i32
    return %arg0, %c0_i32, %c0_i32_0 : i32, i32, i32
  }
}

</mosaic_0001>

<bundles_post_ra>
// kernel: hamnet_forward.1
= control target key start
LH: loop header
LB: loop body
LE: loop exit
PB: predicated region body
PF: predicated region fallthrough
CT: control target
= control target key end

     0   :  { %10 = vsyncpa [#allocation4], 0  ;;  %s1871_s0 = inlined_call_operand.vmem [shape: f32[2,3,256], index: 0, kind: input, shape index: {}]   ;;  %s1872_s1 = inlined_call_operand.vmem [shape: f32[3,128,1], index: 1, kind: input, shape index: {}]   ;;  %s1873_s2 = inlined_call_operand.vmem [shape: f32[128,1], index: 2, kind: input, shape index: {}]   ;;  %s1874_s3 = inlined_call_operand.vmem [shape: f32[128,128], index: 3, kind: input, shape index: {}]   ;;  %s1875_s4 = inlined_call_operand.vmem [shape: f32[1,128], index: 4, kind: input, shape index: {}]   ;;  %s1876_s5 = inlined_call_operand.hbm [shape: f32[2,1,128], index: 5, kind: output, shape index: {}]  }
   0x1   :  { %12 = vsyncpa [#allocation4 + $0x1], 0  ;;  %s1374_s18 = smov 0   ;;  %s1376_s19 = smov 0  }
   0x2   :  { %s1378_s20 = smov 0   ;;  %s1380_s21 = smov 0  }
   0x3   :  { %s1382_s22 = smov 0   ;;  %s1384_s23 = smov 0  }
   0x4   :  { %s1386_s24 = smov 0   ;;  %s1388_s25 = smov 0  }
   0x5 LB: > { %s1075_s26 = sadd.s32 4294967295, %s1340_s25   ;;  %s1076_s27 = sadd.s32 4294967294, %s1340_s25   ;;  %s1340_s25 = sphi %s1388_s25, %s18_s25   ;;  %s1336_s24 = sphi %s1386_s24, %s1887_s24   ;;  %s1332_s23 = sphi %s1384_s23, %s1886_s23   ;;  %s1328_s22 = sphi %s1382_s22, %s1885_s22   ;;  %s1324_s21 = sphi %s1380_s21, %s1884_s21   ;;  %s1320_s20 = sphi %s1378_s20, %s1883_s20   ;;  %s1316_s19 = sphi %s1376_s19, %s1882_s19   ;;  %s1312_s18 = sphi %s1374_s18, %s1881_s18  }
   0x6   : > { %s27_s28 = sadd.s32 1, %s1332_s23  ;;  %s30_s29 = sadd.s32 1, %s1336_s24 }
   0x7   : > { %p28_p0 = scmp.ge.s32.totalorder %s27_s28, 2  ;;  %p159_p1 = scmp.ne.s32.totalorder %s1320_s20, %s1316_s19 }
   0x8   : > { %p160_p2 = scmp.eq.s32.totalorder %s1075_s26, 3  ;;  %p165_p4 = scmp.ne.s32.totalorder %s1316_s19, %s1312_s18 }
   0x9   : > { %s1889_s28 = smov (%p28_p0, %s27_s28), 0  ;;  %s1891_s29 = smov (!%p28_p0, %s30_s29), %s1336_s24 }
   0xa   : > { %p1423_p3 = por %p160_p2, %p159_p1  ;;  %p32_p5 = scmp.ge.s32.totalorder %s1891_s29, 2 }
   0xb   : > { %p166_p6 = scmp.eq.s32.totalorder %s1076_s27, 3  ;;  %p1079_p7 = scmp.ge.s32.totalorder %s1340_s25, 1 }
   0xc   : > { %p207_p8 = scmp.lt.s32.totalorder %s1340_s25, 5  ;;  %s1893_s29 = smov (%p32_p5, %s1891_s29), 0 }
   0xd   : > { %p1433_p9 = por %p166_p6, %p165_p4  ;;  %s146_s7 = ssub.s32 %s1336_s24, %s1893_s29 }
   0xe   : > { %p208_p10 = pnand %p1079_p7, %p207_p8  ;;  %s149_s8 = sadd.s32 1, %s1320_s20 }
   0xf   : > { %p147_p11 = scmp.eq.s32.totalorder %s146_s7, 0  ;;  %s1877_s10 = sand.u32 (!%p208_p10), 1, %s1316_s19  }
  0x10   : > { %211 = sbr.rel (%p208_p10) target bundleno = 1045 (0x415), region = 40  ;;  %p237_p12 = scmp.lt.s32.totalorder (!%p208_p10), %s1328_s22, 1 }
  0x11   : > { %s1441_s9 = scalar_select %p147_p11, %s1320_s20, %s149_s8  }
  0x12   : > { %p239_p13 = scmp.lt.s32.totalorder (!%p208_p10), %s1324_s21, 1  ;;  %s1455_s27 = scalar_lea.vmem (!%p208_p10), [#allocation3], %s1877_s10 }
  0x13   : > { %p1082_p0 = scmp.ne.s32.totalorder (!%p208_p10), %s1324_s21, 0 }
  0x15   : > { %s238_s11 = scalar_select %p237_p12, %s1328_s22, 1 }
  0x16   : > { %s240_s12 = scalar_select %p239_p13, %s1324_s21, 1 }
  0x17   : > { %s1080_s13 = sshll.u32 %s238_s11, 1  ;;  %248 = sbr.rel (%p1082_p0) target bundleno = 45 (0x2d), region = 44 }
  0x18   : > { %s242_s14 = sadd.s32 %s1080_s13, %s240_s12 }
  0x19   : > { %s1081_s15 = sshll.u32 %s242_s14, 2 }
  0x1a   : > { %s1451_s26 = scalar_lea.vmem %s1871_s0, %s1081_s15 }
  0x1c   : > { %v1342_v0 = vmov 0.0  }
  0x1d   : > { %249 = vst [vmem:[#allocation2 + $0x30] sm:$0xff] %v1342_v0 }
  0x1e   : > { %250 = vst [vmem:[#allocation2] sm:$0xff] %v1342_v0 }
  0x1f   : > { %251 = vst [vmem:[#allocation2 + $0x58] sm:$0xff] %v1342_v0 }
  0x20   : > { %252 = vst [vmem:[#allocation2 + $0x18] sm:$0xff] %v1342_v0 }
  0x21   : > { %253 = vst [vmem:[#allocation2 + $0x50] sm:$0xff] %v1342_v0 }
  0x22   : > { %254 = vst [vmem:[#allocation2 + $0x68] sm:$0xff] %v1342_v0 }
  0x23   : > { %255 = vst [vmem:[#allocation2 + $0x8] sm:$0xff] %v1342_v0 }
  0x24   : > { %256 = vst [vmem:[#allocation2 + $0x48] sm:$0xff] %v1342_v0 }
  0x25   : > { %257 = vst [vmem:[#allocation2 + $0x40] sm:$0xff] %v1342_v0 }
  0x26   : > { %258 = vst [vmem:[#allocation2 + $0x20] sm:$0xff] %v1342_v0 }
  0x27   : > { %259 = vst [vmem:[#allocation2 + $0x10] sm:$0xff] %v1342_v0 }
  0x28   : > { %260 = vst [vmem:[#allocation2 + $0x38] sm:$0xff] %v1342_v0 }
  0x29   : > { %261 = vst [vmem:[#allocation2 + $0x60] sm:$0xff] %v1342_v0 }
  0x2a   : > { %262 = vst [vmem:[#allocation2 + $0x70] sm:$0xff] %v1342_v0 }
  0x2b   : > { %263 = vst [vmem:[#allocation2 + $0x78] sm:$0xff] %v1342_v0 }
  0x2c   : > { %264 = vst [vmem:[#allocation2 + $0x28] sm:$0xff] %v1342_v0 }
  0x2d PF: > { %v269_v1 = vld [vmem:[%s1872_s1 + $0x20] sm:$0xff]  ;;  %v267_v2 = vld [vmem:[%s1872_s1 + $0x10] sm:$0xff]  ;;  %v1343_v4 = vmov 0   ;;  %v270_v5 = vld [vmem:[%s1872_s1 + $0x28] sm:$0xff]  ;;  %p1115_p1 = scmp.ne.s32.totalorder %s1324_s21, 1 }
  0x2e   : > { %v265_v3 = vld [vmem:[%s1872_s1] sm:$0xff]  ;;  %1241 = vset.pattern.permute.xlu2 %v1343_v4  ;;  %1240 = vset.pattern.permute.xlu1 %v1343_v4  ;;  %v268_v6 = vld [vmem:[%s1872_s1 + $0x18] sm:$0xff]  ;;  %v266_v7 = vld [vmem:[%s1872_s1 + $0x8] sm:$0xff] }
  0x2f   : > { %1239 = vset.pattern.permute.xlu0 %v1343_v4  ;;  %372 = vperm.xlu2 %1241, %v269_v1   ;;  %v273_v8 = vld [vmem:[%s1872_s1 + $0x40] sm:$0xff]  ;;  %v272_v9 = vld [vmem:[%s1872_s1 + $0x38] sm:$0xff]  ;;  %v271_v10 = vld [vmem:[%s1872_s1 + $0x30] sm:$0xff] }
  0x30   : > { %362 = vperm.xlu1 %1240, %v267_v2   ;;  %352 = vperm.xlu0 %1239, %v265_v3   ;;  %v276_v11 = vld [vmem:[%s1872_s1 + $0x58] sm:$0xff]  ;;  %v275_v12 = vld [vmem:[%s1872_s1 + $0x50] sm:$0xff]  ;;  %v274_v13 = vld [vmem:[%s1872_s1 + $0x48] sm:$0xff] }
  0x31   : > { %v279_v14 = vld [vmem:[%s1872_s1 + $0x70] sm:$0xff]  ;;  %v278_v15 = vld [vmem:[%s1872_s1 + $0x68] sm:$0xff]  ;;  %v277_v16 = vld [vmem:[%s1872_s1 + $0x60] sm:$0xff] }
  0x32   : > { %v1084_v17 = vld [vmem:[%s1872_s1 + $0x88] sm:$0xff]  ;;  %v1083_v18 = vld [vmem:[%s1872_s1 + $0x80] sm:$0xff]  ;;  %v280_v19 = vld [vmem:[%s1872_s1 + $0x78] sm:$0xff] }
  0x33   : > { %v1087_v20 = vld [vmem:[%s1872_s1 + $0xa0] sm:$0xff]  ;;  %v1086_v21 = vld [vmem:[%s1872_s1 + $0x98] sm:$0xff]  ;;  %v1085_v22 = vld [vmem:[%s1872_s1 + $0x90] sm:$0xff] }
  0x34   : > { %v1090_v23 = vld [vmem:[%s1872_s1 + $0xb8] sm:$0xff]  ;;  %v1089_v24 = vld [vmem:[%s1872_s1 + $0xb0] sm:$0xff]  ;;  %v1088_v25 = vld [vmem:[%s1872_s1 + $0xa8] sm:$0xff] }
  0x35   : > { %v1093_v26 = vld [vmem:[%s1872_s1 + $0xd0] sm:$0xff]  ;;  %v1092_v27 = vld [vmem:[%s1872_s1 + $0xc8] sm:$0xff]  ;;  %v1091_v28 = vld [vmem:[%s1872_s1 + $0xc0] sm:$0xff] }
  0x36   : > { %v1096_v29 = vld [vmem:[%s1872_s1 + $0xe8] sm:$0xff]  ;;  %v1095_v30 = vld [vmem:[%s1872_s1 + $0xe0] sm:$0xff]  ;;  %v1094_v31 = vld [vmem:[%s1872_s1 + $0xd8] sm:$0xff] }
  0x37   : > { %377 = vperm.xlu2 %1241, %v270_v5   ;;  %v1099_v32 = vld [vmem:[%s1872_s1 + $0x100] sm:$0xff]  ;;  %v1098_v33 = vld [vmem:[%s1872_s1 + $0xf8] sm:$0xff]  ;;  %v1097_v34 = vld [vmem:[%s1872_s1 + $0xf0] sm:$0xff] }
  0x38   : > { %367 = vperm.xlu1 %1240, %v268_v6   ;;  %357 = vperm.xlu0 %1239, %v266_v7   ;;  %v1102_v35 = vld [vmem:[%s1872_s1 + $0x118] sm:$0xff]  ;;  %v1101_v36 = vld [vmem:[%s1872_s1 + $0x110] sm:$0xff]  ;;  %v1100_v37 = vld [vmem:[%s1872_s1 + $0x108] sm:$0xff] }
  0x39   : > { %v1105_v39 = vld [vmem:[%s1872_s1 + $0x130] sm:$0xff]  ;;  %v1104_v40 = vld [vmem:[%s1872_s1 + $0x128] sm:$0xff]  ;;  %v1103_v41 = vld [vmem:[%s1872_s1 + $0x120] sm:$0xff] }
  0x3a   : > { %v1108_v43 = vld [vmem:[%s1872_s1 + $0x148] sm:$0xff]  ;;  %v1107_v44 = vld [vmem:[%s1872_s1 + $0x140] sm:$0xff]  ;;  %v1106_v45 = vld [vmem:[%s1872_s1 + $0x138] sm:$0xff] }
  0x3b   : > { %v1111_v47 = vld [vmem:[%s1872_s1 + $0x160] sm:$0xff]  ;;  %v1110_v48 = vld [vmem:[%s1872_s1 + $0x158] sm:$0xff]  ;;  %v1109_v49 = vld [vmem:[%s1872_s1 + $0x150] sm:$0xff] }
  0x3c   : > { %v1114_v53 = vld [vmem:[%s1872_s1 + $0x178] sm:$0xff]  ;;  %v1113_v54 = vld [vmem:[%s1872_s1 + $0x170] sm:$0xff]  ;;  %v1112_v55 = vld [vmem:[%s1872_s1 + $0x168] sm:$0xff] }
  0x3d   : > { %v319_v59 = vld [vmem:[%s1873_s2 + $0x10] sm:$0xff]  ;;  %v1618_v60 = vld [vmem:[%s1451_s26] sm:$0x7]  ;;  %v318_v61 = vld [vmem:[%s1873_s2 + $0x8] sm:$0xff] }
  0x3e   : > { %v317_v62 = vld [vmem:[%s1873_s2] sm:$0xff]  ;;  %v1627_v63 = vperm.slane %v1618_v60, 1  ;;  %v1630_v0 = vperm.slane %v1618_v60, 0  ;;  %v322_v7 = vld [vmem:[%s1873_s2 + $0x28] sm:$0xff] }
  0x3f   : > { %392 = vperm.xlu2 %1241, %v273_v8   ;;  %v321_v8 = vld [vmem:[%s1873_s2 + $0x20] sm:$0xff] }
  0x40   : > { %387 = vperm.xlu1 %1240, %v272_v9   ;;  %382 = vperm.xlu0 %1239, %v271_v10   ;;  %v320_v9 = vld [vmem:[%s1873_s2 + $0x18] sm:$0xff] }
  0x47   : > { %407 = vperm.xlu2 %1241, %v276_v11  }
  0x48   : > { %402 = vperm.xlu1 %1240, %v275_v12   ;;  %397 = vperm.xlu0 %1239, %v274_v13  }
  0x4f   : > { %422 = vperm.xlu2 %1241, %v279_v14  }
  0x50   : > { %417 = vperm.xlu1 %1240, %v278_v15   ;;  %412 = vperm.xlu0 %1239, %v277_v16   ;;  %v325_v16 = vld [vmem:[%s1873_s2 + $0x40] sm:$0xff] }
  0x57   : > { %454 = vperm.xlu2 %1241, %v1084_v17   ;;  %v324_v17 = vld [vmem:[%s1873_s2 + $0x38] sm:$0xff] }
  0x58   : > { %449 = vperm.xlu1 %1240, %v1083_v18   ;;  %427 = vperm.xlu0 %1239, %v280_v19   ;;  %v323_v18 = vld [vmem:[%s1873_s2 + $0x30] sm:$0xff] }
  0x5f   : > { %469 = vperm.xlu2 %1241, %v1087_v20  }
  0x60   : > { %464 = vperm.xlu1 %1240, %v1086_v21   ;;  %459 = vperm.xlu0 %1239, %v1085_v22  }
  0x67   : > { %484 = vperm.xlu2 %1241, %v1090_v23  }
  0x68   : > { %479 = vperm.xlu1 %1240, %v1089_v24   ;;  %474 = vperm.xlu0 %1239, %v1088_v25   ;;  %v328_v25 = vld [vmem:[%s1873_s2 + $0x58] sm:$0xff] }
  0x6f   : > { %499 = vperm.xlu2 %1241, %v1093_v26   ;;  %v327_v26 = vld [vmem:[%s1873_s2 + $0x50] sm:$0xff] }
  0x70   : > { %494 = vperm.xlu1 %1240, %v1092_v27   ;;  %489 = vperm.xlu0 %1239, %v1091_v28   ;;  %v326_v27 = vld [vmem:[%s1873_s2 + $0x48] sm:$0xff] }
  0x77   : > { %514 = vperm.xlu2 %1241, %v1096_v29  }
  0x78   : > { %509 = vperm.xlu1 %1240, %v1095_v30   ;;  %504 = vperm.xlu0 %1239, %v1094_v31  }
  0x7f   : > { %562 = vperm.xlu2 %1241, %v1099_v32  }
  0x80   : > { %524 = vperm.xlu1 %1240, %v1098_v33   ;;  %519 = vperm.xlu0 %1239, %v1097_v34  }
  0x87   : > { %577 = vperm.xlu2 %1241, %v1102_v35  }
  0x88   : > { %572 = vperm.xlu1 %1240, %v1101_v36   ;;  %567 = vperm.xlu0 %1239, %v1100_v37   ;;  %v331_v36 = vld [vmem:[%s1873_s2 + $0x70] sm:$0xff] }
  0x89   : > { %v373_v38 = vpop.permute.xlu2 %372 }
  0x8a   : > { %v435_v11 = vmul.f32 %v1630_v0, %v373_v38  ;;  %v330_v38 = vld [vmem:[%s1873_s2 + $0x68] sm:$0xff] }
  0x8f   : > { %592 = vperm.xlu2 %1241, %v1105_v39   ;;  %v329_v39 = vld [vmem:[%s1873_s2 + $0x60] sm:$0xff] }
  0x90   : > { %587 = vperm.xlu1 %1240, %v1104_v40   ;;  %582 = vperm.xlu0 %1239, %v1103_v41  }
  0x91   : > { %v1575_v42 = vpop.permute.xlu2 %377 }
  0x97   : > { %607 = vperm.xlu2 %1241, %v1108_v43  }
  0x98   : > { %602 = vperm.xlu1 %1240, %v1107_v44   ;;  %597 = vperm.xlu0 %1239, %v1106_v45  }
  0x99   : > { %v1586_v46 = vpop.permute.xlu2 %392 }
  0x9f   : > { %622 = vperm.xlu2 %1241, %v1111_v47  }
  0xa0   : > { %617 = vperm.xlu1 %1240, %v1110_v48   ;;  %612 = vperm.xlu0 %1239, %v1109_v49  }
  0xa1   : > { %v1597_v50 = vpop.permute.xlu2 %407 }
  0xa2   : > { %v1599_v51 = vpop.permute.xlu1 %362  ;;  %v353_v52 = vpop.permute.xlu0 %352 }
  0xa3   : > { %v431_v33 = vmul.f32 %v1630_v0, %v353_v52 }
  0xa7   : > { %637 = vperm.xlu2 %1241, %v1114_v53   ;;  %v332_v53 = vld [vmem:[%s1873_s2 + $0x78] sm:$0xff] }
  0xa8   : > { %632 = vperm.xlu1 %1240, %v1113_v54   ;;  %627 = vperm.xlu0 %1239, %v1112_v55   ;;  %v1699_v54 = vperm.slane %v1618_v60, 2 }
  0xa9   : > { %v1610_v56 = vpop.permute.xlu2 %422 }
  0xaa   : > { %v1612_v57 = vpop.permute.xlu1 %367  ;;  %v358_v58 = vpop.permute.xlu0 %357 }
  0xab   : > { %v432_v2 = vmul.f32 %v1630_v0, %v358_v58  ;;  %v434_v47 = vmul.f32 %v1630_v0, %v1612_v57 }
  0xaf   : > { %685 = vperm.xlu2 %1241, %v319_v59  }
  0xb0   : > { %680 = vperm.xlu1 %1240, %v318_v61   ;;  %675 = vperm.xlu0 %1239, %v317_v62  }
  0xb1   : > { %v455_v1 = vpop.permute.xlu2 %454 }
  0xb2   : > { %v529_v3 = vmul.f32 %v1627_v63, %v455_v1  ;;  %v388_v4 = vpop.permute.xlu1 %387  ;;  %v1634_v5 = vpop.permute.xlu0 %382 }
  0xb3   : > { %v438_v20 = vmul.f32 %v1630_v0, %v388_v4  ;;  %v437_v57 = vmul.f32 %v1630_v0, %v1634_v5 }
  0xb4   : > { %v1636_v6 = vadd.f32 %v529_v3, %v432_v2 }
  0xb7   : > { %700 = vperm.xlu2 %1241, %v322_v7  }
  0xb8   : > { %695 = vperm.xlu1 %1240, %v321_v8   ;;  %690 = vperm.xlu0 %1239, %v320_v9  }
  0xb9   : > { %v470_v10 = vpop.permute.xlu2 %469 }
  0xba   : > { %v532_v12 = vmul.f32 %v1627_v63, %v470_v10  ;;  %v403_v13 = vpop.permute.xlu1 %402  ;;  %v398_v14 = vpop.permute.xlu0 %397 }
  0xbb   : > { %v441_v29 = vmul.f32 %v1630_v0, %v403_v13  ;;  %v440_v8 = vmul.f32 %v1630_v0, %v398_v14 }
  0xbc   : > { %v1649_v15 = vadd.f32 %v532_v12, %v435_v11 }
  0xbf   : > { %715 = vperm.xlu2 %1241, %v325_v16  }
  0xc0   : > { %710 = vperm.xlu1 %1240, %v324_v17   ;;  %705 = vperm.xlu0 %1239, %v323_v18  }
  0xc1   : > { %v485_v19 = vpop.permute.xlu2 %484 }
  0xc2   : > { %v535_v21 = vmul.f32 %v1627_v63, %v485_v19  ;;  %v418_v22 = vpop.permute.xlu1 %417  ;;  %v413_v23 = vpop.permute.xlu0 %412 }
  0xc3   : > { %v444_v41 = vmul.f32 %v1630_v0, %v418_v22  ;;  %v443_v17 = vmul.f32 %v1630_v0, %v413_v23 }
  0xc4   : > { %v1662_v24 = vadd.f32 %v535_v21, %v438_v20 }
  0xc7   : > { %730 = vperm.xlu2 %1241, %v328_v25  }
  0xc8   : > { %725 = vperm.xlu1 %1240, %v327_v26   ;;  %720 = vperm.xlu0 %1239, %v326_v27  }
  0xc9   : > { %v500_v28 = vpop.permute.xlu2 %499 }
  0xca   : > { %v538_v30 = vmul.f32 %v1627_v63, %v500_v28  ;;  %v450_v31 = vpop.permute.xlu1 %449  ;;  %v428_v32 = vpop.permute.xlu0 %427 }
  0xcb   : > { %v528_v34 = vmul.f32 %v1627_v63, %v450_v31  ;;  %v446_v26 = vmul.f32 %v1630_v0, %v428_v32  ;;  %v433_v32 = vmul.f32 %v1630_v0, %v1599_v51 }
  0xcc   : > { %v1677_v35 = vadd.f32 %v538_v30, %v441_v29 }
  0xcd   : > { %v544_v37 = vadd.f32 %v528_v34, %v431_v33 }
  0xcf   : > { %745 = vperm.xlu2 %1241, %v331_v36  }
  0xd0   : > { %740 = vperm.xlu1 %1240, %v330_v38   ;;  %735 = vperm.xlu0 %1239, %v329_v39  }
  0xd1   : > { %v515_v40 = vpop.permute.xlu2 %514 }
  0xd2   : > { %v541_v43 = vmul.f32 %v1627_v63, %v515_v40  ;;  %v465_v44 = vpop.permute.xlu1 %464  ;;  %v460_v45 = vpop.permute.xlu0 %459 }
  0xd3   : > { %v531_v48 = vmul.f32 %v1627_v63, %v465_v44 }
  0xd4   : > { %v1693_v49 = vadd.f32 %v541_v43, %v444_v41 }
  0xd5   : > { %v547_v52 = vadd.f32 %v531_v48, %v434_v47 }
  0xd8   : > { %750 = vperm.xlu0 %1239, %v332_v53  }
  0xd9   : > { %v563_v55 = vpop.permute.xlu2 %562 }
  0xda   : > { %v641_v58 = vmul.f32 %v1699_v54, %v563_v55  ;;  %v480_v59 = vpop.permute.xlu1 %479  ;;  %v475_v61 = vpop.permute.xlu0 %474 }
  0xdb   : > { %v534_v62 = vmul.f32 %v1627_v63, %v480_v59  ;;  %v436_v59 = vmul.f32 %v1630_v0, %v1575_v42 }
  0xdc   : > { %v1705_v1 = vadd.f32 %v641_v58, %v544_v37  ;;  %v530_v37 = vmul.f32 %v1627_v63, %v460_v45  ;;  %v335_v45 = vld [vmem:[#allocation2 + $0x58] sm:$0xff] }
  0xdd   : > { %v550_v2 = vadd.f32 %v534_v62, %v437_v57 }
  0xde   : > { %v546_v44 = vadd.f32 %v530_v37, %v433_v32 }
  0xe1   : > { %v578_v3 = vpop.permute.xlu2 %577 }
  0xe2   : > { %v644_v4 = vmul.f32 %v1699_v54, %v578_v3  ;;  %v495_v7 = vpop.permute.xlu1 %494  ;;  %v490_v60 = vpop.permute.xlu0 %489 }
  0xe3   : > { %v537_v9 = vmul.f32 %v1627_v63, %v495_v7  ;;  %v536_v7 = vmul.f32 %v1627_v63, %v490_v60 }
  0xe4   : > { %v1710_v10 = vadd.f32 %v644_v4, %v547_v52  ;;  %v533_v52 = vmul.f32 %v1627_v63, %v475_v61 }
  0xe5   : > { %v553_v11 = vadd.f32 %v537_v9, %v440_v8 }
  0xe6   : > { %v549_v62 = vadd.f32 %v533_v52, %v436_v59 }
  0xe9   : > { %v593_v12 = vpop.permute.xlu2 %592 }
  0xea   : > { %v647_v5 = vmul.f32 %v1699_v54, %v593_v12  ;;  %v510_v13 = vpop.permute.xlu1 %509  ;;  %v505_v16 = vpop.permute.xlu0 %504  ;;  %v439_v12 = vmul.f32 %v1630_v0, %v1586_v46 }
  0xeb   : > { %v540_v18 = vmul.f32 %v1627_v63, %v510_v13 }
  0xec   : > { %v1715_v19 = vadd.f32 %v647_v5, %v550_v2  ;;  %v552_v13 = vadd.f32 %v536_v7, %v439_v12 }
  0xed   : > { %v556_v20 = vadd.f32 %v540_v18, %v443_v17 }
  0xf1   : > { %v608_v21 = vpop.permute.xlu2 %607 }
  0xf2   : > { %v650_v14 = vmul.f32 %v1699_v54, %v608_v21  ;;  %v525_v22 = vpop.permute.xlu1 %524  ;;  %v520_v25 = vpop.permute.xlu0 %519  ;;  %v539_v21 = vmul.f32 %v1627_v63, %v505_v16 }
  0xf3   : > { %v543_v27 = vmul.f32 %v1627_v63, %v525_v22 }
  0xf4   : > { %v1720_v28 = vadd.f32 %v650_v14, %v553_v11  ;;  %v338_v11 = vld [vmem:[#allocation2 + $0x68] sm:$0xff] }
  0xf5   : > { %v559_v29 = vadd.f32 %v543_v27, %v446_v26  ;;  %v341_v26 = vld [vmem:[#allocation2 + $0x40] sm:$0xff]  ;;  %v442_v27 = vmul.f32 %v1630_v0, %v1597_v50 }
  0xf9   : > { %v623_v30 = vpop.permute.xlu2 %622 }
  0xfa   : > { %v653_v23 = vmul.f32 %v1699_v54, %v623_v30  ;;  %v573_v31 = vpop.permute.xlu1 %572  ;;  %v568_v33 = vpop.permute.xlu0 %567 }
  0xfb   : > { %v643_v41 = vmul.f32 %v1699_v54, %v573_v31  ;;  %v642_v30 = vmul.f32 %v1699_v54, %v568_v33 }
  0xfc   : > { %v1723_v34 = vadd.f32 %v653_v23, %v556_v20  ;;  %v555_v23 = vadd.f32 %v539_v21, %v442_v27 }
  0xfd   : > { %v659_v47 = vadd.f32 %v643_v41, %v546_v44  ;;  %v658_v16 = vadd.f32 %v642_v30, %v1636_v6  ;;  %v344_v44 = vld [vmem:[#allocation2 + $0x38] sm:$0xff] }
 0x101   : > { %v638_v36 = vpop.permute.xlu2 %637 }
 0x102   : > { %v656_v38 = vmul.f32 %v1699_v54, %v638_v36  ;;  %v588_v39 = vpop.permute.xlu1 %587  ;;  %v583_v40 = vpop.permute.xlu0 %582 }
 0x103   : > { %v646_v57 = vmul.f32 %v1699_v54, %v588_v39 }
 0x104   : > { %v1730_v43 = vadd.f32 %v656_v38, %v559_v29  ;;  %v542_v38 = vmul.f32 %v1627_v63, %v520_v25 }
 0x105   : > { %v662_v3 = vadd.f32 %v646_v57, %v549_v62 }
 0x109   : > { %v686_v48 = vpop.permute.xlu2 %685 }
 0x10a   : > { %v755_v53 = vadd.f32 %v686_v48, %v659_v47  ;;  %v603_v55 = vpop.permute.xlu1 %602  ;;  %v1733_v58 = vpop.permute.xlu0 %597  ;;  %v445_v48 = vmul.f32 %v1630_v0, %v1610_v56 }
 0x10b   : > { %v649_v42 = vmul.f32 %v1699_v54, %v603_v55  ;;  %v333_v55 = vld [vmem:[#allocation2 + $0x30] sm:$0xff]  ;;  %v648_v12 = vmul.f32 %v1699_v54, %v1733_v58 }
 0x10c   : > { %v771_v51 = vmax.f32 %v755_v53, 0.0  ;;  %v334_v53 = vld [vmem:[#allocation2] sm:$0xff]  ;;  %v558_v63 = vadd.f32 %v542_v38, %v445_v48 }
 0x10d   : > { %v665_v18 = vadd.f32 %v649_v42, %v552_v13 }
 0x10e   : > { %v787_v2 = vadd.f32 %v771_v51, %v335_v45  ;;  %v645_v45 = vmul.f32 %v1699_v54, %v583_v40 }
 0x110   : > { %803 = vst [vmem:[#allocation2 + $0x58] sm:$0xff] %v787_v2  ;;  %v661_v2 = vadd.f32 %v645_v45, %v1649_v15  ;;  %v664_v15 = vadd.f32 %v648_v12, %v1662_v24 }
 0x111   : > { %v701_v4 = vpop.permute.xlu2 %700 }
 0x112   : > { %v758_v8 = vadd.f32 %v701_v4, %v662_v3  ;;  %v618_v61 = vpop.permute.xlu1 %617  ;;  %v1739_v9 = vpop.permute.xlu0 %612  ;;  %v347_v4 = vld [vmem:[#allocation2 + $0x78] sm:$0xff] }
 0x113   : > { %v652_v46 = vmul.f32 %v1699_v54, %v618_v61  ;;  %v337_v61 = vld [vmem:[#allocation2 + $0x50] sm:$0xff]  ;;  %v651_v58 = vmul.f32 %v1699_v54, %v1739_v9 }
 0x114   : > { %v774_v5 = vmax.f32 %v758_v8, 0.0 }
 0x115   : > { %v668_v36 = vadd.f32 %v652_v46, %v555_v23  ;;  %v667_v23 = vadd.f32 %v651_v58, %v1677_v35 }
 0x116   : > { %v790_v17 = vadd.f32 %v774_v5, %v338_v11  ;;  %v336_v11 = vld [vmem:[#allocation2 + $0x18] sm:$0xff] }
 0x118   : > { %806 = vst [vmem:[#allocation2 + $0x68] sm:$0xff] %v790_v17 }
 0x119   : > { %v716_v20 = vpop.permute.xlu2 %715 }
 0x11a   : > { %v761_v14 = vadd.f32 %v716_v20, %v665_v18  ;;  %v633_v60 = vpop.permute.xlu1 %632  ;;  %v1745_v22 = vpop.permute.xlu0 %627 }
 0x11b   : > { %v655_v33 = vmul.f32 %v1699_v54, %v633_v60  ;;  %v340_v60 = vld [vmem:[#allocation2 + $0x48] sm:$0xff]  ;;  %v654_v38 = vmul.f32 %v1699_v54, %v1745_v22 }
 0x11c   : > { %v777_v29 = vmax.f32 %v761_v14, 0.0 }
 0x11d   : > { %v671_v62 = vadd.f32 %v655_v33, %v558_v63  ;;  %v346_v33 = vld [vmem:[#allocation2 + $0x70] sm:$0xff] }
 0x11e   : > { %v793_v31 = vadd.f32 %v777_v29, %v341_v26  ;;  %v339_v26 = vld [vmem:[#allocation2 + $0x8] sm:$0xff] }
 0x120   : > { %809 = vst [vmem:[#allocation2 + $0x40] sm:$0xff] %v793_v31 }
 0x121   : > { %v731_v37 = vpop.permute.xlu2 %730 }
 0x122   : > { %v764_v39 = vadd.f32 %v731_v37, %v668_v36  ;;  %v681_v32 = vpop.permute.xlu1 %680  ;;  %v676_v41 = vpop.permute.xlu0 %675 }
 0x123   : > { %v754_v47 = vadd.f32 %v681_v32, %v658_v16  ;;  %v753_v50 = vadd.f32 %v676_v41, %v1705_v1  ;;  %v343_v16 = vld [vmem:[#allocation2 + $0x10] sm:$0xff] }
 0x124   : > { %v780_v52 = vmax.f32 %v764_v39, 0.0 }
 0x125   : > { %v770_v6 = vmax.f32 %v754_v47, 0.0  ;;  %v769_v59 = vmax.f32 %v753_v50, 0.0 }
 0x126   : > { %v796_v25 = vadd.f32 %v780_v52, %v344_v44  ;;  %v670_v44 = vadd.f32 %v654_v38, %v1693_v49 }
 0x127   : > { %v786_v57 = vadd.f32 %v770_v6, %v334_v53  ;;  %v785_v51 = vadd.f32 %v769_v59, %v333_v55  ;;  %v348_v6 = vld [vmem:[#allocation2 + $0x28] sm:$0xff] }
 0x128   : > { %812 = vst [vmem:[#allocation2 + $0x38] sm:$0xff] %v796_v25 }
 0x129   : > { %802 = vst [vmem:[#allocation2] sm:$0xff] %v786_v57  ;;  %v746_v1 = vpop.permute.xlu2 %745 }
 0x12a   : > { %801 = vst [vmem:[#allocation2 + $0x30] sm:$0xff] %v785_v51  ;;  %v767_v56 = vadd.f32 %v746_v1, %v671_v62  ;;  %v696_v0 = vpop.permute.xlu1 %695  ;;  %v691_v3 = vpop.permute.xlu0 %690 }
 0x12b   : > { %v757_v7 = vadd.f32 %v696_v0, %v661_v2  ;;  %v756_v40 = vadd.f32 %v691_v3, %v1710_v10 }
 0x12c   : > { %v783_v8 = vmax.f32 %v767_v56, 0.0 }
 0x12d   : > { %v773_v42 = vmax.f32 %v757_v7, 0.0  ;;  %v772_v5 = vmax.f32 %v756_v40, 0.0 }
 0x12e   : > { %v799_v13 = vadd.f32 %v783_v8, %v347_v4 }
 0x12f   : > { %v789_v17 = vadd.f32 %v773_v42, %v337_v61  ;;  %v788_v18 = vadd.f32 %v772_v5, %v336_v11 }
 0x130   : > { %815 = vst [vmem:[#allocation2 + $0x78] sm:$0xff] %v799_v13 }
 0x131   : > { %805 = vst [vmem:[#allocation2 + $0x50] sm:$0xff] %v789_v17 }
 0x132   : > { %804 = vst [vmem:[#allocation2 + $0x18] sm:$0xff] %v788_v18  ;;  %v711_v20 = vpop.permute.xlu1 %710  ;;  %v706_v21 = vpop.permute.xlu0 %705 }
 0x133   : > { %v760_v14 = vadd.f32 %v711_v20, %v664_v15  ;;  %v759_v10 = vadd.f32 %v706_v21, %v1715_v19  ;;  %v342_v19 = vld [vmem:[#allocation2 + $0x20] sm:$0xff] }
 0x135   : > { %v776_v27 = vmax.f32 %v760_v14, 0.0  ;;  %v775_v46 = vmax.f32 %v759_v10, 0.0 }
 0x137   : > { %v792_v29 = vadd.f32 %v776_v27, %v340_v60  ;;  %v791_v30 = vadd.f32 %v775_v46, %v339_v26 }
 0x139   : > { %808 = vst [vmem:[#allocation2 + $0x48] sm:$0xff] %v792_v29 }
 0x13a   : > { %807 = vst [vmem:[#allocation2 + $0x8] sm:$0xff] %v791_v30  ;;  %v726_v24 = vpop.permute.xlu1 %725  ;;  %v721_v31 = vpop.permute.xlu0 %720 }
 0x13b   : > { %v763_v36 = vadd.f32 %v726_v24, %v667_v23  ;;  %v762_v37 = vadd.f32 %v721_v31, %v1720_v28  ;;  %v345_v28 = vld [vmem:[#allocation2 + $0x60] sm:$0xff] }
 0x13d   : > { %v779_v39 = vmax.f32 %v763_v36, 0.0  ;;  %v778_v9 = vmax.f32 %v762_v37, 0.0 }
 0x13f   : > { %v795_v32 = vadd.f32 %v779_v39, %v343_v16  ;;  %v794_v41 = vadd.f32 %v778_v9, %v342_v19 }
 0x141   : > { %811 = vst [vmem:[#allocation2 + $0x10] sm:$0xff] %v795_v32 }
 0x142   : > { %810 = vst [vmem:[#allocation2 + $0x20] sm:$0xff] %v794_v41  ;;  %v741_v35 = vpop.permute.xlu1 %740  ;;  %v736_v47 = vpop.permute.xlu0 %735 }
 0x143   : > { %v766_v50 = vadd.f32 %v741_v35, %v670_v44  ;;  %v765_v48 = vadd.f32 %v736_v47, %v1723_v34 }
 0x145   : > { %v782_v52 = vmax.f32 %v766_v50, 0.0  ;;  %v781_v53 = vmax.f32 %v765_v48, 0.0 }
 0x147   : > { %v798_v55 = vadd.f32 %v782_v52, %v346_v33  ;;  %v797_v45 = vadd.f32 %v781_v53, %v345_v28 }
 0x149   : > { %814 = vst [vmem:[#allocation2 + $0x70] sm:$0xff] %v798_v55 }
 0x14a   : > { %813 = vst [vmem:[#allocation2 + $0x60] sm:$0xff] %v797_v45  ;;  %v751_v54 = vpop.permute.xlu0 %750 }
 0x14b   : > { %v768_v22 = vadd.f32 %v751_v54, %v1730_v43 }
 0x14d   : > { %v784_v59 = vmax.f32 %v768_v22, 0.0  ;;  %820 = sbr.rel (%p1115_p1) target bundleno = 1031 (0x407), region = 48 }
 0x14f   : > { %v800_v49 = vadd.f32 %v784_v59, %v348_v6 }
 0x151   : > { %816 = vst [vmem:[#allocation2 + $0x28] sm:$0xff] %v800_v49 }
 0x152   : > { %v821_v63 = vld [vmem:[#allocation2 + $0x30] sm:$0xff]  ;;  %v822_v34 = vld [vmem:[#allocation2] sm:$0xff]  ;;  %v823_v25 = vld [vmem:[#allocation2 + $0x58] sm:$0xff]  ;;  %vm974_vm0 = vcmask 1040384  }
 0x153   : > { %853 = vxpose.xlu0.b32.start [1/16] %v821_v63, 128  ;;  %v824_v57 = vld [vmem:[#allocation2 + $0x18] sm:$0xff]  ;;  %v825_v51 = vld [vmem:[#allocation2 + $0x50] sm:$0xff]  ;;  %v826_v62 = vld [vmem:[#allocation2 + $0x68] sm:$0xff] }
 0x154   : > { %v827_v43 = vld [vmem:[#allocation2 + $0x8] sm:$0xff]  ;;  %v829_v2 = vld [vmem:[#allocation2 + $0x40] sm:$0xff]  ;;  %v831_v0 = vld [vmem:[#allocation2 + $0x10] sm:$0xff] }
 0x155   : > { %v828_v1 = vld [vmem:[#allocation2 + $0x48] sm:$0xff]  ;;  %v830_v56 = vld [vmem:[#allocation2 + $0x20] sm:$0xff]  ;;  %v832_v3 = vld [vmem:[#allocation2 + $0x38] sm:$0xff] }
 0x156   : > { %v852_v4 = vld [vmem:[%s1874_s3 + $0x78] sm:$0xff]  ;;  %v851_v7 = vld [vmem:[%s1874_s3 + $0x70] sm:$0xff]  ;;  %v850_v40 = vld [vmem:[%s1874_s3 + $0x68] sm:$0xff] }
 0x157   : > { %885 = vmatpush.msra.mxu0 %v852_v4  ;;  %1118 = vmatpush.msra.mxu1 %v852_v4  ;;  %v849_v8 = vld [vmem:[%s1874_s3 + $0x60] sm:$0xff]  ;;  %v848_v11 = vld [vmem:[%s1874_s3 + $0x58] sm:$0xff]  ;;  %v847_v12 = vld [vmem:[%s1874_s3 + $0x50] sm:$0xff] }
 0x158   : > { %1119 = vmatpush.msra.mxu2 %v852_v4  ;;  %1120 = vmatpush.msra.mxu3 %v852_v4  ;;  %v833_v61 = vld [vmem:[#allocation2 + $0x60] sm:$0xff]  ;;  %v846_v42 = vld [vmem:[%s1874_s3 + $0x48] sm:$0xff]  ;;  %v834_v13 = vld [vmem:[#allocation2 + $0x70] sm:$0xff] }
 0x159   : > { %886 = vmatpush.msra.mxu0 %v851_v7  ;;  %1121 = vmatpush.msra.mxu1 %v851_v7  ;;  %v845_v5 = vld [vmem:[%s1874_s3 + $0x40] sm:$0xff]  ;;  %v844_v17 = vld [vmem:[%s1874_s3 + $0x38] sm:$0xff]  ;;  %v843_v18 = vld [vmem:[%s1874_s3 + $0x30] sm:$0xff] }
 0x15a   : > { %1122 = vmatpush.msra.mxu2 %v851_v7  ;;  %1123 = vmatpush.msra.mxu3 %v851_v7  ;;  %v842_v15 = vld [vmem:[%s1874_s3 + $0x28] sm:$0xff]  ;;  %v841_v20 = vld [vmem:[%s1874_s3 + $0x20] sm:$0xff]  ;;  %v835_v21 = vld [vmem:[#allocation2 + $0x78] sm:$0xff] }
 0x15b   : > { %854 = vxpose.xlu0.b32.cont [2/16] %v822_v34, 128  ;;  %887 = vmatpush.msra.mxu0 %v850_v40  ;;  %v840_v14 = vld [vmem:[%s1874_s3 + $0x18] sm:$0xff]  ;;  %v839_v10 = vld [vmem:[%s1874_s3 + $0x10] sm:$0xff]  ;;  %v838_v60 = vld [vmem:[%s1874_s3 + $0x8] sm:$0xff] }
 0x15c   : > { %1124 = vmatpush.msra.mxu1 %v850_v40  ;;  %1125 = vmatpush.msra.mxu2 %v850_v40  ;;  %v837_v26 = vld [vmem:[%s1874_s3] sm:$0xff]  ;;  %v836_v58 = vld [vmem:[#allocation2 + $0x28] sm:$0xff] }
 0x15d   : > { %1126 = vmatpush.msra.mxu3 %v850_v40  ;;  %888 = vmatpush.msra.mxu0 %v849_v8 }
 0x15e   : > { %1127 = vmatpush.msra.mxu1 %v849_v8  ;;  %1128 = vmatpush.msra.mxu2 %v849_v8 }
 0x15f   : > { %889 = vmatpush.msra.mxu0 %v848_v11  ;;  %1129 = vmatpush.msra.mxu3 %v849_v8 }
 0x160   : > { %1130 = vmatpush.msra.mxu1 %v848_v11  ;;  %1131 = vmatpush.msra.mxu2 %v848_v11 }
 0x161   : > { %890 = vmatpush.msra.mxu0 %v847_v12  ;;  %1132 = vmatpush.msra.mxu3 %v848_v11 }
 0x162   : > { %1133 = vmatpush.msra.mxu1 %v847_v12  ;;  %1134 = vmatpush.msra.mxu2 %v847_v12 }
 0x163   : > { %855 = vxpose.xlu0.b32.cont [3/16] %v823_v25, 128  ;;  %891 = vmatpush.msra.mxu0 %v846_v42 }
 0x164   : > { %1136 = vmatpush.msra.mxu1 %v846_v42  ;;  %1137 = vmatpush.msra.mxu2 %v846_v42 }
 0x165   : > { %1135 = vmatpush.msra.mxu3 %v847_v12  ;;  %892 = vmatpush.msra.mxu0 %v845_v5 }
 0x166   : > { %1139 = vmatpush.msra.mxu1 %v845_v5  ;;  %1140 = vmatpush.msra.mxu2 %v845_v5 }
 0x167   : > { %893 = vmatpush.msra.mxu0 %v844_v17  ;;  %1138 = vmatpush.msra.mxu3 %v846_v42 }
 0x168   : > { %1142 = vmatpush.msra.mxu1 %v844_v17  ;;  %1143 = vmatpush.msra.mxu2 %v844_v17 }
 0x169   : > { %894 = vmatpush.msra.mxu0 %v843_v18  ;;  %1141 = vmatpush.msra.mxu3 %v845_v5 }
 0x16a   : > { %1145 = vmatpush.msra.mxu1 %v843_v18  ;;  %1146 = vmatpush.msra.mxu2 %v843_v18 }
 0x16b   : > { %856 = vxpose.xlu0.b32.cont [4/16] %v824_v57, 128  ;;  %895 = vmatpush.msra.mxu0 %v842_v15 }
 0x16c   : > { %1148 = vmatpush.msra.mxu1 %v842_v15  ;;  %1149 = vmatpush.msra.mxu2 %v842_v15 }
 0x16d   : > { %1144 = vmatpush.msra.mxu3 %v844_v17  ;;  %896 = vmatpush.msra.mxu0 %v841_v20 }
 0x16e   : > { %1151 = vmatpush.msra.mxu1 %v841_v20  ;;  %1152 = vmatpush.msra.mxu2 %v841_v20 }
 0x16f   : > { %897 = vmatpush.msra.mxu0 %v840_v14  ;;  %1147 = vmatpush.msra.mxu3 %v843_v18 }
 0x170   : > { %1154 = vmatpush.msra.mxu1 %v840_v14  ;;  %1155 = vmatpush.msra.mxu2 %v840_v14 }
 0x171   : > { %898 = vmatpush.msra.mxu0 %v839_v10  ;;  %1150 = vmatpush.msra.mxu3 %v842_v15 }
 0x172   : > { %1157 = vmatpush.msra.mxu1 %v839_v10  ;;  %1158 = vmatpush.msra.mxu2 %v839_v10 }
 0x173   : > { %857 = vxpose.xlu0.b32.cont [5/16] %v825_v51, 128  ;;  %899 = vmatpush.msra.mxu0 %v838_v60 }
 0x174   : > { %1160 = vmatpush.msra.mxu1 %v838_v60  ;;  %1161 = vmatpush.msra.mxu2 %v838_v60 }
 0x175   : > { %1153 = vmatpush.msra.mxu3 %v841_v20  ;;  %900 = vmatpush.msra.mxu0 %v837_v26 }
 0x176   : > { %1163 = vmatpush.msra.mxu1 %v837_v26  ;;  %1164 = vmatpush.msra.mxu2 %v837_v26 }
 0x177   : > { %1156 = vmatpush.msra.mxu3 %v840_v14 }
 0x179   : > { %1159 = vmatpush.msra.mxu3 %v839_v10 }
 0x17b   : > { %858 = vxpose.xlu0.b32.cont [6/16] %v826_v62, 128  ;;  %1162 = vmatpush.msra.mxu3 %v838_v60 }
 0x17d   : > { %1165 = vmatpush.msra.mxu3 %v837_v26 }
 0x183   : > { %859 = vxpose.xlu0.b32.cont [7/16] %v827_v43, 128 }
 0x18b   : > { %860 = vxpose.xlu0.b32.cont [8/16] %v828_v1, 128 }
 0x193   : > { %861 = vxpose.xlu0.b32.cont [9/16] %v829_v2, 128 }
 0x19b   : > { %862 = vxpose.xlu0.b32.cont [10/16] %v830_v56, 128 }
 0x1a3   : > { %863 = vxpose.xlu0.b32.cont [11/16] %v831_v0, 128 }
 0x1ab   : > { %864 = vxpose.xlu0.b32.cont [12/16] %v832_v3, 128 }
 0x1b3   : > { %865 = vxpose.xlu0.b32.cont [13/16] %v833_v61, 128 }
 0x1bb   : > { %866 = vxpose.xlu0.b32.cont [14/16] %v834_v13, 128  ;;  %v972_v13 = vld [vmem:[%s1875_s4] sm:$0x1] }
 0x1c3   : > { %867 = vxpose.xlu0.b32.cont [15/16] %v835_v21, 128 }
 0x1cb   : > { %868 = vxpose.xlu0.b32.end [16/16] %v836_v58, 128 }
 0x1f7   : > { %v869_v27 = vpop.trf.xlu0 }
 0x1f8   : > { %901 = vmatmul.f32.vlgmr.msra.gmra.mxu0 %v869_v27 }
 0x1ff   : > { %v870_v46 = vpop.trf.xlu0 }
 0x200   : > { %904 = vmatmul.f32.gmra.mxu0 %v870_v46 }
 0x207   : > { %v871_v29 = vpop.trf.xlu0 }
 0x208   : > { %907 = vmatmul.f32.gmra.mxu0 %v871_v29 }
 0x20f   : > { %v872_v30 = vpop.trf.xlu0 }
 0x210   : > { %910 = vmatmul.f32.gmra.mxu0 %v872_v30 }
 0x217   : > { %v873_v23 = vpop.trf.xlu0 }
 0x218   : > { %913 = vmatmul.f32.vlgmr.msra.gmra.mxu1 %v873_v23 }
 0x21f   : > { %v874_v24 = vpop.trf.xlu0 }
 0x220   : > { %916 = vmatmul.f32.gmra.mxu1 %v874_v24 }
 0x227   : > { %v875_v31 = vpop.trf.xlu0 }
 0x228   : > { %919 = vmatmul.f32.gmra.mxu1 %v875_v31 }
 0x22f   : > { %v876_v36 = vpop.trf.xlu0 }
 0x230   : > { %922 = vmatmul.f32.gmra.mxu1 %v876_v36 }
 0x237   : > { %v877_v37 = vpop.trf.xlu0 }
 0x238   : > { %925 = vmatmul.f32.vlgmr.msra.gmra.mxu2 %v877_v37 }
 0x23f   : > { %v878_v16 = vpop.trf.xlu0 }
 0x240   : > { %928 = vmatmul.f32.gmra.mxu2 %v878_v16 }
 0x247   : > { %v879_v19 = vpop.trf.xlu0 }
 0x248   : > { %931 = vmatmul.f32.gmra.mxu2 %v879_v19 }
 0x24f   : > { %v880_v38 = vpop.trf.xlu0 }
 0x250   : > { %934 = vmatmul.f32.gmra.mxu2 %v880_v38 }
 0x257   : > { %v881_v39 = vpop.trf.xlu0 }
 0x258   : > { %937 = vmatmul.f32.vlgmr.msra.gmra.mxu3 %v881_v39 }
 0x25f   : > { %v882_v9 = vpop.trf.xlu0 }
 0x260   : > { %940 = vmatmul.f32.gmra.mxu3 %v882_v9 }
 0x267   : > { %v883_v32 = vpop.trf.xlu0 }
 0x268   : > { %943 = vmatmul.f32.gmra.mxu3 %v883_v32 }
 0x26f   : > { %v884_v41 = vpop.trf.xlu0 }
 0x270   : > { %946 = vmatmul.f32.gmra.mxu3 %v884_v41 }
 0x275   : > { %v902_v44 = vpop.f32.mrf.mxu0 }
 0x27d   : > { %v905_v47 = vpop.f32.mrf.mxu0 }
 0x27e   : > { %v950_v53 = vadd.f32 %v905_v47, %v902_v44 }
 0x285   : > { %v908_v33 = vpop.f32.mrf.mxu0 }
 0x286   : > { %v951_v45 = vadd.f32 %v950_v53, %v908_v33 }
 0x28d   : > { %v911_v55 = vpop.f32.mrf.mxu0 }
 0x28e   : > { %v952_v22 = vadd.f32 %v951_v45, %v911_v55 }
 0x295   : > { %v914_v35 = vpop.f32.mrf.mxu1 }
 0x296   : > { %v953_v6 = vadd.f32 %v952_v22, %v914_v35 }
 0x29d   : > { %v917_v48 = vpop.f32.mrf.mxu1 }
 0x29e   : > { %v954_v49 = vadd.f32 %v953_v6, %v917_v48 }
 0x2a5   : > { %v920_v52 = vpop.f32.mrf.mxu1 }
 0x2a6   : > { %v955_v34 = vadd.f32 %v954_v49, %v920_v52 }
 0x2ad   : > { %v923_v63 = vpop.f32.mrf.mxu1 }
 0x2ae   : > { %v956_v57 = vadd.f32 %v955_v34, %v923_v63 }
 0x2bb   : > { %v926_v50 = vpop.f32.mrf.mxu2 }
 0x2bc   : > { %v957_v51 = vadd.f32 %v956_v57, %v926_v50 }
 0x2c3   : > { %v929_v28 = vpop.f32.mrf.mxu2 }
 0x2c4   : > { %v958_v62 = vadd.f32 %v957_v51, %v929_v28 }
 0x2cb   : > { %v932_v59 = vpop.f32.mrf.mxu2 }
 0x2cc   : > { %v959_v1 = vadd.f32 %v958_v62, %v932_v59 }
 0x2d3   : > { %v935_v43 = vpop.f32.mrf.mxu2 }
 0x2d4   : > { %v960_v56 = vadd.f32 %v959_v1, %v935_v43 }
 0x2db   : > { %v938_v54 = vpop.f32.mrf.mxu3 }
 0x2dc   : > { %v961_v0 = vadd.f32 %v960_v56, %v938_v54 }
 0x2e3   : > { %v941_v25 = vpop.f32.mrf.mxu3 }
 0x2e4   : > { %v962_v3 = vadd.f32 %v961_v0, %v941_v25 }
 0x2eb   : > { %v944_v2 = vpop.f32.mrf.mxu3 }
 0x2ec   : > { %v963_v4 = vadd.f32 %v962_v3, %v944_v2 }
 0x2f3   : > { %v947_v7 = vpop.f32.mrf.mxu3 }
 0x2f4   : > { %v964_v40 = vadd.f32 %v963_v4, %v947_v7 }
 0x2f6   : > { %v965_v8 = vrot.slane %v964_v40, 4 }
 0x2f8   : > { %v966_v61 = vadd.f32 %v965_v8, %v964_v40 }
 0x2fa   : > { %v967_v11 = vrot.slane %v966_v61, 2 }
 0x2fc   : > { %v968_v12 = vadd.f32 %v967_v11, %v966_v61 }
 0x2fe   : > { %v969_v42 = vrot.slane %v968_v12, 1 }
 0x300   : > { %v970_v5 = vadd.f32 %v969_v42, %v968_v12 }
 0x302   : > { %v971_v17 = vmul.f32 0.00390625, %v970_v5 }
 0x304   : > { %v973_v18 = vadd.f32 %v972_v13, %v971_v17 }
 0x306   : > { %v975_v15 = vsel %vm974_vm0, %v973_v18, -inf }
 0x307   : > { %976 = vmax.xlane.f32.xlu1 %v975_v15 }
 0x37a   : > { %v977_v20 = vpop.xlane.xlu1 %976 }
 0x37b   : > { %v978_v21 = vsub.f32 %v973_v18, %v977_v20 }
 0x37d   : > { %v979_v14 = vmul.f32 1.442695, %v978_v21 }
 0x37f   : > { %1242 = vpow2.f32 %v979_v14 }
 0x385   : > { %v1243_v10 = vpop.eup %1242 }
 0x386   : > { %v981_v60 = vsel %vm974_vm0, %v1243_v10, 0.0 }
 0x387   : > { %982 = vadd.xlane.f32.xlu1 %v981_v60 }
 0x3fa   : > { %v983_v26 = vpop.xlane.xlu1 %982 }
 0x3fb   : > { %1244 = vlog2.f32 %v983_v26 }
 0x401   : > { %v1245_v58 = vpop.eup %1244 }
 0x402   : > { %v985_v27 = vmul.f32 0.6931472, %v1245_v58 }
 0x404   : > { %v986_v46 = vsub.f32 %v978_v21, %v985_v27 }
 0x406   : > { %987 = vst [vmem:[%s1455_s27] sm:$0x1] %v986_v46 }
 0x407 PF: > { %s997_s21 = scalar_lea.hbm %s1876_s5, %s1328_s22  ;;  %s999_s14 = sshll.u32 %s1455_s27, 4  ;;  %s1000_s14 = int_to_ptr.vmem [resolvable:$true] %s999_s14 }
 0x408   : > { %s1001_s15 = sshll.u32 %s997_s21, 4  ;;  %s1880_s16 = sand.u32 1, %s1316_s19   ;;  %s1002_s15 = int_to_ptr.hbm [resolvable:$true] %s1001_s15 }
 0x409   : > { %s989_s17 = scalar_lea.sflag [#allocation4], %s1880_s16  ;;  %s1260_s7 = sshra.s32 %s1002_s15, 4  ;;  %s1261_s7 = int_to_ptr.hbm [resolvable:$true] %s1260_s7 }
 0x40a   : > { %s1262_s8 = scalar_lea.hbm %s1261_s7, 1  ;;  %s1266_s12 = scalar_lea.hbm %s1876_s5, 2 }
 0x40b   : > { %p1263_p2 = scmp.ne.s32.totalorder %s1261_s7, %s1262_s8  ;;  %p1267_p6 = scmp.lt.s32.totalorder %s1261_s7, %s1876_s5 }
 0x40c   : > { %p1268_p7 = scmp.lt.s32.totalorder %s1266_s12, %s1262_s8 }
 0x40d   : > { %p1264_p4 = pnand %p1263_p2, %p1423_p3 }
 0x40e   : > { %p1269_p8 = por %p1268_p7, %p1267_p6 }
 0x40f   : > { %p1265_p5 = pneg %p1264_p4 }
 0x411   : > { %p1270_p10 = pnand %p1269_p8, %p1265_p5 }
 0x413   : > { %1273 = shalt.err (!%p1270_p10)
}
 0x414   : > { %1166 = dma.vmem_to_hbm [thread:$0]  (%p1423_p3), %s1000_s14, 16, %s1002_s15, %s989_s17  }
 0x415 PF: > { %p1172_p11 = scmp.ge.s32.totalorder %s1340_s25, 2  ;;  %s1013_s22 = sand.u32 1, %s1312_s18  }
 0x416   : > { %s1014_s27 = scalar_lea.sflag [#allocation4], %s1013_s22 }
 0x417   : > { %p1169_p12 = pnand %p1172_p11, %p1433_p9 }
 0x419   : > { %p1170_p13 = pneg %p1169_p12 }
 0x41b   : > { %1307 = dma.done.wait (%p1170_p13), %s1014_s27, 16  }
 0x41c   : > { %1309 = vsyncadd (%p1170_p13), %s1014_s27, 4294967280  ;;  %s18_s25 = sadd.s32 1, %s1340_s25   ;;  %s1881_s18 = smov %s1316_s19 }
 0x41d   : > { %p15_p0 = scmp.ge.s32.totalorder %s18_s25, 6   ;;  %s1882_s19 = smov %s1320_s20 }
 0x41e   : > { %s1883_s20 = smov %s1441_s9  ;;  %s1884_s21 = smov %s1332_s23 }
 0x41f   : > { %s1885_s22 = smov %s1336_s24  ;;  %s1886_s23 = smov %s1889_s28 }
 0x420   : > { %s1887_s24 = smov %s1893_s29  ;;  %17 = sbr.rel (!%p15_p0) target bundleno = 5 (0x5), region = 85 }
 0x425   :  { %1019 = vsyncpa [#allocation4], 1 }
 0x426   :  { %1021 = vsyncpa [#allocation4 + $0x1], 1 }

</bundles_post_ra>
